<compile_context>
chip_gen: v5e
topology: v5e:2x2
jax: 0.10.0
libtpu: 0.0.40
codegen_flags: <defaults>
</compile_context>

<pallas_src>
import jax
import jax.numpy as jnp
from jax.experimental import pallas as pl
from jax.experimental.pallas import tpu as pltpu


_FAST_PATH_BYTES = 128 << 10          # below this, plain fused XLA sigmoid wins
_VMEM_LIMIT_FLOOR = 16 << 20          # never request less than the v5e default
_VMEM_LIMIT_CEIL = 32 << 20           # stay within every generation's scoped VMEM


def _sigmoid_kernel(x_ref, o_ref):
    # Elementwise hot path: exp goes to the EUP, add/div on the VPU.
    # TODO(synk): if a bundle dump ever shows the divide on the critical path,
    # switch to e = jnp.exp(-x); pl.reciprocal(1.0 + e, approx=True).
    o_ref[...] = jax.nn.sigmoid(x_ref[...])


def _tpu_hints():
    """Best-effort (target_block_bytes, prefer_even_grid_steps) per TPU gen."""
    try:
        kind = jax.devices()[0].device_kind.lower()
    except Exception:
        kind = ""
    if "v7" in kind:
        # 3.2 TB/s HBM -> per-step overhead is proportionally larger, so use
        # bigger blocks; but only 64 MiB physical VMEM (32 MiB scoped), so
        # 6 MiB blocks keep the 4 x block pipeline footprint at ~26 MiB.
        # Two TensorCores -> prefer an even number of grid steps.
        return 6 << 20, True
    # v5e / v6e: 4 MiB blocks are already in the ~90% roofline regime and the
    # 4 x block (+ headroom) budget is requested explicitly via vmem_limit.
    return 4 << 20, False


def _choose_layout(n, itemsize, target_block_bytes, prefer_even_steps):
    """Pick (lanes, padded_n, tile_rows) for a flat array of n elements."""
    sublanes = max(8, 32 // itemsize)     # 8 for f32, 16 for bf16, 32 for int8/fp8

    # Widest pad-free lane dimension (lane-dense, wide unmasked stores).
    lanes = 0
    for cand in (1024, 512, 256, 128):
        if n % cand == 0:
            lanes = cand
            break
    if lanes == 0:                        # rare ragged-lane case: pad to 128
        lanes = 128
        padded_n = -(-n // lanes) * lanes
    else:
        padded_n = n
    rows = padded_n // lanes
    row_bytes = lanes * itemsize

    max_block_rows = max(
        sublanes, (target_block_bytes // row_bytes) // sublanes * sublanes)

    if rows <= max_block_rows:
        # Single block covering the whole array: block dims == array dims, so
        # the (8,128) divisibility rule is waived and no row padding is needed.
        return lanes, padded_n, rows

    tile_rows = max_block_rows
    if prefer_even_steps:
        num_steps = -(-rows // tile_rows)
        if num_steps % 2 == 1:
            cand = -(-rows // (num_steps + 1))
            cand = max(sublanes, -(-cand // sublanes) * sublanes)
            if cand < rows:
                tile_rows = cand
    return lanes, padded_n, tile_rows


def _sigmoid_2d(x2d, tile_rows):
    """Apply sigmoid over a lane-dense (rows, lanes) array, row-tiled grid."""
    rows, lanes = x2d.shape
    itemsize = x2d.dtype.itemsize
    nbytes = x2d.size * itemsize
    block_bytes = tile_rows * lanes * itemsize
    # Explicit budget: 2 pipeline buffers x (in + out) blocks, plus headroom.
    vmem_limit = min(max(4 * block_bytes + (2 << 20), _VMEM_LIMIT_FLOOR),
                     _VMEM_LIMIT_CEIL)
    return pl.pallas_call(
        _sigmoid_kernel,
        out_shape=jax.ShapeDtypeStruct((rows, lanes), x2d.dtype),
        grid_spec=pl.GridSpec(
            # Boundary block (rows % tile_rows != 0) is clipped/masked by Pallas.
            grid=(pl.cdiv(rows, tile_rows),),
            in_specs=[pl.BlockSpec((tile_rows, lanes), lambda i: (i, 0))],
            out_specs=pl.BlockSpec((tile_rows, lanes), lambda i: (i, 0)),
        ),
        compiler_params=pltpu.CompilerParams(
            dimension_semantics=("parallel",),
            vmem_limit_bytes=vmem_limit,
        ),
        cost_estimate=pl.CostEstimate(
            flops=2 * x2d.size,
            transcendentals=x2d.size,
            bytes_accessed=2 * nbytes,
        ),
    )(x2d)


def my_network_forward(x, *, force_pallas=False):
    """MyNetwork.forward: elementwise sigmoid; input shape/dtype preserved."""
    n = x.size
    itemsize = jnp.dtype(x.dtype).itemsize

    if (not force_pallas) and n * itemsize <= _FAST_PATH_BYTES:
        # Tiny tensors (e.g. the 8 KiB example workload): launch + reshape
        # overhead dwarfs data movement, so let XLA fuse the elementwise op.
        return jax.nn.sigmoid(x)

    target_block_bytes, prefer_even = _tpu_hints()
    lanes, padded_n, tile_rows = _choose_layout(
        n, itemsize, target_block_bytes, prefer_even)

    flat = x.reshape(-1)
    if padded_n != n:                     # rare: n not a multiple of 128
        flat = jnp.pad(flat, (0, padded_n - n))

    out2d = _sigmoid_2d(flat.reshape(padded_n // lanes, lanes), tile_rows)

    out = out2d.reshape(-1)
    if padded_n != n:
        out = out[:n]
    return out.reshape(x.shape)


if __name__ == "__main__":
    key = jax.random.PRNGKey(0)
    # Input consistent with the original script: NCHW (2, 4, 16, 16),
    # reshaped to (-1, 1, 2, 2) before the module (sigmoid is elementwise).
    x = jax.random.normal(key, (2, 4, 16, 16), dtype=jnp.float32)
    x_in = jnp.reshape(x, (-1, 1, 2, 2))            # (512, 1, 2, 2)
    ref = jax.nn.sigmoid(x_in)

    # Default wrapper: small input takes the fused-XLA fast path.
    out = jax.block_until_ready(my_network_forward(x_in))
    assert out.shape == x_in.shape and out.dtype == x_in.dtype
    assert jnp.allclose(out, ref, atol=1e-6, rtol=1e-6)

    # Same input forced through the Pallas kernel (single full-array block).
    out_k = jax.block_until_ready(my_network_forward(x_in, force_pallas=True))
    assert jnp.allclose(out_k, ref, atol=1e-6, rtol=1e-6)

    # Larger input: pad-free, multi-step auto-pipelined grid (~4-6 MiB blocks).
    x_big = jax.random.normal(jax.random.PRNGKey(1), (16, 64, 64, 64), jnp.float32)
    out_big = jax.block_until_ready(my_network_forward(x_big))
    assert jnp.allclose(out_big, jax.nn.sigmoid(x_big), atol=1e-6, rtol=1e-6)

    # Ragged row count: boundary block clipped by Pallas (no wrapper pad/slice).
    x_rag = jax.random.normal(jax.random.PRNGKey(2), (1125, 1024), jnp.float32)
    out_rag = jax.block_until_ready(my_network_forward(x_rag))
    assert jnp.allclose(out_rag, jax.nn.sigmoid(x_rag), atol=1e-6, rtol=1e-6)

    # Ragged lane count (n % 128 != 0): the rare pad/slice branch.
    x_odd = jax.random.normal(jax.random.PRNGKey(3), (3, 5, 7, 11), jnp.float32)
    out_odd = jax.block_until_ready(my_network_forward(x_odd, force_pallas=True))
    assert jnp.allclose(out_odd, jax.nn.sigmoid(x_odd), atol=1e-6, rtol=1e-6)

    print("KERNEL_OK")
</pallas_src>

<mosaic_0001>
module attributes {stable_mosaic.version = 11 : i64} {
  func.func @_sigmoid_kernel(%arg0: i32, %arg1: memref<2x1024xf32, #tpu.memory_space<vmem>>, %arg2: memref<2x1024xf32, #tpu.memory_space<vmem>>) attributes {dimension_semantics = [#tpu.dimension_semantics<parallel>], iteration_bounds = array<i64: 1>, scalar_prefetch = 0 : i64, scratch_operands = 0 : i64, tpu.core_type = #tpu.core_type<tc>, window_params = [{transform_indices = @transform_0, window_bounds = array<i64: 2, 1024>}, {transform_indices = @transform_1, window_bounds = array<i64: 2, 1024>}]} {
    %c0 = arith.constant 0 : index
    %c0_0 = arith.constant 0 : index
    %0 = vector.load %arg1[%c0, %c0_0] : memref<2x1024xf32, #tpu.memory_space<vmem>>, vector<2x1024xf32>
    %1 = arith.negf %0 : vector<2x1024xf32>
    %2 = math.exp %1 : vector<2x1024xf32>
    %cst = arith.constant 1.000000e+00 : f32
    %3 = vector.broadcast %cst : f32 to vector<2x1024xf32>
    %4 = arith.addf %3, %2 : vector<2x1024xf32>
    %5 = arith.divf %3, %4 : vector<2x1024xf32>
    %c0_1 = arith.constant 0 : index
    %c0_2 = arith.constant 0 : index
    %6 = vector.load %arg2[%c0_1, %c0_2] : memref<2x1024xf32, #tpu.memory_space<vmem>>, vector<2x1024xf32>
    tpu.vector_store %arg2[%c0_1, %c0_2], %5 {strides = array<i32>} : memref<2x1024xf32, #tpu.memory_space<vmem>>, vector<2x1024xf32>,
    return
  }
  func.func @transform_0(%arg0: i32) -> (i32, i32) {
    %c0_i32 = arith.constant 0 : i32
    %c0_i32_0 = arith.constant 0 : i32
    return %arg0, %c0_i32 : i32, i32
  }
  func.func @transform_1(%arg0: i32) -> (i32, i32) {
    %c0_i32 = arith.constant 0 : i32
    %c0_i32_0 = arith.constant 0 : i32
    return %arg0, %c0_i32 : i32, i32
  }
}

</mosaic_0001>

<bundles_post_ra>
// kernel: tpu_custom_call.1
= control target key start
LH: loop header
LB: loop body
LE: loop exit
PB: predicated region body
PF: predicated region fallthrough
CT: control target
= control target key end

     0   :  { %6 = vsyncpa [#allocation3], 0  ;;  %s164_s0 = inlined_call_operand.hbm [shape: f32[2,1024], index: 0, kind: input, shape index: {}]   ;;  %s165_s1 = inlined_call_operand.hbm [shape: f32[2,1024], index: 1, kind: output, shape index: {}]  }
   0x1   :  { %7 = vsyncpa [#allocation4], 0  ;;  %s13_s8 = sshll.u32 %s164_s0, 4  ;;  %s146_s9 = smov [#allocation2]   ;;  %s14_s8 = int_to_ptr.hbm [resolvable:$true] %s13_s8 }
   0x2   :  { %s15_s10 = sshll.u32 %s146_s9, 4  ;;  %s16_s10 = int_to_ptr.vmem [resolvable:$true] %s15_s10 }
   0x3   :  { %18 = dma.hbm_to_vmem [thread:$0]  %s14_s8, 256, %s16_s10, [#allocation3]  }
   0x4   :  { %142 = dma.done.wait [#allocation3], 256  }
   0x5   :  { %143 = vsyncadd [#allocation3], 4294967040  ;;  %v23_v0 = vld [vmem:[#allocation2] sm:$0xff]  ;;  %v24_v1 = vld [vmem:[#allocation2 + $0x8] sm:$0xff]  ;;  %s147_s0 = smov [#allocation5]   ;;  %s72_s14 = sshll.u32 %s165_s1, 4  ;;  %s73_s14 = int_to_ptr.hbm [resolvable:$true] %s72_s14 }
   0x6   :  { %v82_v2 = vmul.f32 -1.442695, %v23_v0  ;;  %v83_v3 = vmul.f32 -1.442695, %v24_v1  ;;  %s70_s11 = sshll.u32 %s147_s0, 4  ;;  %s71_s11 = int_to_ptr.vmem [resolvable:$true] %s70_s11 }
   0x8   :  { %86 = vpow2.f32 %v82_v2 }
   0x9   :  { %88 = vpow2.f32 %v83_v3 }
   0xe   :  { %v87_v4 = vpop.eup %86 }
   0xf   :  { %v89_v5 = vpop.eup %88  ;;  %v31_v6 = vadd.f32 1.0, %v87_v4 }
  0x10   :  { %v32_v7 = vadd.f32 1.0, %v89_v5 }
  0x11   :  { %90 = vrcp.f32 %v31_v6  ;;  %vm38_vm0 = vweird.f32 %v31_v6  ;;  %v44_v11 = vand.u32 2147483648, %v31_v6  ;;  %v42_v14 = vand.u32 2147483647, %v31_v6 }
  0x12   :  { %92 = vrcp.f32 %v32_v7  ;;  %v59_v15 = vand.u32 2147483648, %v32_v7  ;;  %vm53_vm2 = vweird.f32 %v32_v7  ;;  %v57_v17 = vand.u32 2147483647, %v32_v7 }
  0x13   :  { %v45_v19 = vor.u32 1.1754944e-38, %v44_v11  ;;  %vm43_vm5 = vcmp.eq.f32.partialorder %v42_v14, 8.507059e+37 }
  0x14   :  { %v60_v22 = vor.u32 1.1754944e-38, %v59_v15  ;;  %vm58_vm7 = vcmp.eq.f32.partialorder %v57_v17, 8.507059e+37 }
  0x17   :  { %v91_v8 = vpop.eup %90 }
  0x18   :  { %v93_v9 = vpop.eup %92  ;;  %v34_v10 = vmul.f32 %v91_v8, %v31_v6  ;;  %vm39_vm1 = vweird.f32 %v91_v8 }
  0x19   :  { %v49_v12 = vmul.f32 %v93_v9, %v32_v7  ;;  %vm54_vm3 = vweird.f32 %v93_v9  ;;  %vm40_vm4 = vmor %vm38_vm0, %vm39_vm1 }
  0x1a   :  { %v35_v13 = vsub.f32 1.0, %v34_v10  ;;  %vm55_vm6 = vmor %vm53_vm2, %vm54_vm3 }
  0x1b   :  { %v50_v16 = vsub.f32 1.0, %v49_v12 }
  0x1c   :  { %v36_v18 = vmul.f32 %v91_v8, %v35_v13 }
  0x1d   :  { %v51_v20 = vmul.f32 %v93_v9, %v50_v16 }
  0x1e   :  { %v37_v21 = vadd.f32 %v91_v8, %v36_v18 }
  0x1f   :  { %v52_v23 = vadd.f32 %v93_v9, %v51_v20 }
  0x20   :  { %v41_v24 = vsel %vm40_vm4, %v91_v8, %v37_v21 }
  0x21   :  { %v46_v25 = vsel %vm43_vm5, %v45_v19, %v41_v24  ;;  %v56_v26 = vsel %vm55_vm6, %v93_v9, %v52_v23 }
  0x22   :  { %63 = vst [vmem:[#allocation5] sm:$0xff] %v46_v25  ;;  %v61_v27 = vsel %vm58_vm7, %v60_v22, %v56_v26 }
  0x23   :  { %64 = vst [vmem:[#allocation5 + $0x8] sm:$0xff] %v61_v27 }
  0x24   :  { %75 = dma.vmem_to_hbm [thread:$0]  %s71_s11, 256, %s73_s14, [#allocation4]  }
  0x25   :  { %144 = dma.done.wait [#allocation4], 256  }
  0x26   :  { %145 = vsyncadd [#allocation4], 4294967040 }
  0x27   :  { %80 = vsyncpa [#allocation3], 1 }
  0x28   :  { %81 = vsyncpa [#allocation4], 1 }

</bundles_post_ra>
